<compile_context>
chip_gen: v7x
topology: tpu7x:2x2x1
jax: 0.10.0
libtpu: 0.0.40
codegen_flags: <defaults>
</compile_context>

<pallas_src>
import functools

import jax
import jax.numpy as jnp
from jax.experimental import pallas as pl
from jax.experimental.pallas import tpu as pltpu

_LANE = 128


def _round_up(x, m):
    return (x + m - 1) // m * m


def _default_block_batch():
    # v5e's MXU is 128 wide: TB=128 already fills a pass and halves f32 vreg
    # pressure.  v6e/v7x have 256-wide MXUs: use TB=256.
    try:
        kind = jax.devices()[0].device_kind.lower()
    except Exception:
        return 256
    if "v5e" in kind or "v5 lite" in kind or "v5litepod" in kind:
        return 128
    return 256


def _resident_spec(shape):
    """Grid-invariant block (constant index_map): stays in VMEM across steps.

    Requests single buffering when supported so large weights don't get a
    useless second pipeline buffer (matters for v7x's 64 MiB VMEM)."""
    index_map = lambda i: (0,) * len(shape)
    if hasattr(pl, "Buffered"):
        try:
            return pl.BlockSpec(shape, index_map,
                                pipeline_mode=pl.Buffered(buffer_count=1))
        except Exception:
            pass
    return pl.BlockSpec(shape, index_map)


def _critic_kernel(xt_ref, w1_ref, b1_ref, w2_ref, b2_ref, w3_ref, b3_ref, o_ref):
    # xt_ref: (S, TB) bf16 state tile (batch on lanes) -- the only streamed input.
    xt = xt_ref[...]                                                     # bf16

    h1 = jnp.dot(w1_ref[...], xt, preferred_element_type=jnp.float32)   # (H, TB) f32
    h1 = jnp.maximum(h1 + b1_ref[...], 0.0)                             # bias+ReLU in f32

    h2 = jnp.dot(w2_ref[...], h1.astype(jnp.bfloat16),
                 preferred_element_type=jnp.float32)                    # (H, TB) f32
    h2 = jnp.maximum(h2 + b2_ref[...], 0.0)

    # Value head (out_features == 1): VPU multiply + sublane (XLU) reduce
    # instead of an M=1 MXU pass; stays entirely in f32.
    v = jnp.sum(h2 * w3_ref[...], axis=0, keepdims=True) + b3_ref[...]  # (1, TB)
    o_ref[...] = v.astype(o_ref.dtype)                                  # lane-dense store


@functools.partial(jax.jit, static_argnames=("block_batch",))
def critic_forward(state, params, *, block_batch=None):
    """Pallas forward pass of CriticNetwork.

    state:  (batch, state_size) float32
    params: PyTorch-layout weights:
            w1 (H, S), b1 (H,), w2 (H, H), b2 (H,), w3 (1, H), b3 (1,)
    """
    B, S = state.shape
    H = params["w1"].shape[0]

    if block_batch is None:
        block_batch = _default_block_batch()

    # --- batch tiling: lane-aligned, minimal padding, >=2 tiles when possible ---
    B_pad = _round_up(B, _LANE)
    max_tb = max(_LANE, (min(block_batch, B_pad) // _LANE) * _LANE)
    if B_pad >= 2 * _LANE:                      # give both v7x TensorCores a tile
        max_tb = min(max_tb, max(_LANE, (B_pad // 2) // _LANE * _LANE))
    TB = _LANE
    for cand in range(max_tb, _LANE - 1, -_LANE):
        if B_pad % cand == 0:                   # largest 128-multiple dividing B_pad
            TB = cand
            break
    grid = (B_pad // TB,)

    # Wrapper-side layout plumbing: bf16 state (halves streamed DMA + transpose
    # cost), batch on the lane axis.
    xt = jnp.pad(state.astype(jnp.bfloat16), ((0, B_pad - B), (0, 0))).T   # (S, B_pad)

    w1 = params["w1"].astype(jnp.bfloat16)                   # (H, S)
    w2 = params["w2"].astype(jnp.bfloat16)                   # (H, H)
    w3 = params["w3"].reshape(H, 1).astype(jnp.float32)      # (H, 1) f32 (VPU head)
    b1 = params["b1"].reshape(H, 1).astype(jnp.float32)
    b2 = params["b2"].reshape(H, 1).astype(jnp.float32)
    b3 = params["b3"].reshape(1, 1).astype(jnp.float32)

    flops = 2 * B_pad * (S * H + H * H + H)
    bytes_accessed = (xt.size * 2
                      + (w1.size + w2.size) * 2
                      + (w3.size + b1.size + b2.size + b3.size) * 4
                      + B_pad * 4)

    # Explicit scoped-VMEM budget with headroom (v7x default scoped limit is 32 MiB).
    resident_bytes = ((w1.size + w2.size) * 2
                      + (w3.size + b1.size + b2.size + b3.size) * 4)
    per_step_bytes = 2 * S * TB * 2 + 2 * TB * 4 + 2 * H * TB * 4
    vmem_limit = int(min(max(2 * (resident_bytes + per_step_bytes) + (4 << 20),
                             16 << 20), 48 << 20))

    out = pl.pallas_call(
        _critic_kernel,
        out_shape=jax.ShapeDtypeStruct((1, B_pad), jnp.float32),
        grid=grid,
        in_specs=[
            pl.BlockSpec((S, TB), lambda i: (0, i)),   # streamed state tile
            _resident_spec((H, S)),                    # w1 (resident)
            _resident_spec((H, 1)),                    # b1
            _resident_spec((H, H)),                    # w2 (resident)
            _resident_spec((H, 1)),                    # b2
            _resident_spec((H, 1)),                    # w3 column
            _resident_spec((1, 1)),                    # b3
        ],
        out_specs=pl.BlockSpec((1, TB), lambda i: (0, i)),
        compiler_params=pltpu.CompilerParams(
            dimension_semantics=("parallel",),         # v7x: 2 TCs share the batch grid
            vmem_limit_bytes=vmem_limit),
        cost_estimate=pl.CostEstimate(
            flops=flops, transcendentals=0, bytes_accessed=bytes_accessed),
    )(xt, w1, b1, w2, b2, w3, b3)

    # TODO(synk): if hidden_size grows so large that bf16 w2 exceeds ~16 MiB
    # (H >~ 2900), add a K-tiling grid axis over w2 with an f32 VMEM accumulator
    # (pl.when init/finalize, "arbitrary" axis) instead of keeping w2 resident.
    return out[:, :B].reshape(B, 1)


def init_params(key, state_size, hidden_size):
    """Deterministic init matching nn.Linear shapes (PyTorch (out, in) layout)."""
    k1, k2, k3, k4, k5, k6 = jax.random.split(key, 6)

    def uniform(k, shape, fan_in):
        bound = 1.0 / float(fan_in) ** 0.5
        return jax.random.uniform(k, shape, jnp.float32, -bound, bound)

    return {
        "w1": uniform(k1, (hidden_size, state_size), state_size),
        "b1": uniform(k2, (hidden_size,), state_size),
        "w2": uniform(k3, (hidden_size, hidden_size), hidden_size),
        "b2": uniform(k4, (hidden_size,), hidden_size),
        "w3": uniform(k5, (1, hidden_size), hidden_size),
        "b3": uniform(k6, (1,), hidden_size),
    }


def critic_forward_ref(state, params):
    """Pure-JAX f32 reference (PyTorch semantics: y = x @ W.T + b)."""
    h1 = jnp.maximum(state @ params["w1"].T + params["b1"], 0.0)
    h2 = jnp.maximum(h1 @ params["w2"].T + params["b2"], 0.0)
    return h2 @ params["w3"].T + params["b3"]


if __name__ == "__main__":
    key = jax.random.PRNGKey(0)
    k_param, k_state = jax.random.split(key)

    batch, state_size, hidden_size = 8, 16, 128   # hidden_size matches nn.Linear default
    params = init_params(k_param, state_size, hidden_size)
    state = jax.random.normal(k_state, (batch, state_size), jnp.float32)

    value = critic_forward(state, params)
    value = jax.block_until_ready(value)

    ref = critic_forward_ref(state, params)
    assert value.shape == (batch, 1), value.shape
    # bf16 MXU operands with f32 accumulation: allow bf16-level tolerance vs f32 ref.
    assert jnp.allclose(value, ref, atol=2e-2, rtol=2e-2), (value, ref)

    print("KERNEL_OK")
</pallas_src>

<mosaic_0001>
module attributes {stable_mosaic.version = 11 : i64} {
  func.func @_critic_kernel(%arg0: i32, %arg1: memref<16x128xbf16, #tpu.memory_space<vmem>>, %arg2: memref<128x16xbf16, #tpu.memory_space<vmem>>, %arg3: memref<128x1xf32, #tpu.memory_space<vmem>>, %arg4: memref<128x128xbf16, #tpu.memory_space<vmem>>, %arg5: memref<128x1xf32, #tpu.memory_space<vmem>>, %arg6: memref<128x1xf32, #tpu.memory_space<vmem>>, %arg7: memref<1x1xf32, #tpu.memory_space<vmem>>, %arg8: memref<1x128xf32, #tpu.memory_space<vmem>>) attributes {dimension_semantics = [#tpu.dimension_semantics<parallel>], iteration_bounds = array<i64: 1>, scalar_prefetch = 0 : i64, scratch_operands = 0 : i64, tpu.core_type = #tpu.core_type<tc>, window_params = [{transform_indices = @transform_0, window_bounds = array<i64: 16, 128>}, {pipeline_mode = #tpu.pipeline_mode<synchronous>, transform_indices = @transform_1, window_bounds = array<i64: 128, 16>}, {pipeline_mode = #tpu.pipeline_mode<synchronous>, transform_indices = @transform_2, window_bounds = array<i64: 128, 1>}, {pipeline_mode = #tpu.pipeline_mode<synchronous>, transform_indices = @transform_3, window_bounds = array<i64: 128, 128>}, {pipeline_mode = #tpu.pipeline_mode<synchronous>, transform_indices = @transform_4, window_bounds = array<i64: 128, 1>}, {pipeline_mode = #tpu.pipeline_mode<synchronous>, transform_indices = @transform_5, window_bounds = array<i64: 128, 1>}, {pipeline_mode = #tpu.pipeline_mode<synchronous>, transform_indices = @transform_6, window_bounds = array<i64: 1, 1>}, {transform_indices = @transform_7, window_bounds = array<i64: 1, 128>}]} {
    %c0 = arith.constant 0 : index
    %c0_0 = arith.constant 0 : index
    %0 = vector.load %arg1[%c0, %c0_0] : memref<16x128xbf16, #tpu.memory_space<vmem>>, vector<16x128xbf16>
    %c0_1 = arith.constant 0 : index
    %c0_2 = arith.constant 0 : index
    %1 = vector.load %arg2[%c0_1, %c0_2] : memref<128x16xbf16, #tpu.memory_space<vmem>>, vector<128x16xbf16>
    %cst = arith.constant dense<0.000000e+00> : vector<128x128xf32>
    %2 = tpu.matmul %1, %0, %cst {dimension_numbers = #tpu.dot_dimension_numbers<[1], [0], [0], [1], [0, 0, 1, 1], [], []>} : vector<128x16xbf16>, vector<16x128xbf16>, vector<128x128xf32> -> vector<128x128xf32>
    %c0_3 = arith.constant 0 : index
    %c0_4 = arith.constant 0 : index
    %3 = vector.load %arg3[%c0_3, %c0_4] : memref<128x1xf32, #tpu.memory_space<vmem>>, vector<128x1xf32>
    %4 = vector.broadcast %3 : vector<128x1xf32> to vector<128x128xf32>
    %5 = arith.addf %2, %4 : vector<128x128xf32>
    %cst_5 = arith.constant 0.000000e+00 : f32
    %6 = vector.broadcast %cst_5 : f32 to vector<128x128xf32>
    %7 = arith.maximumf %5, %6 : vector<128x128xf32>
    %c0_6 = arith.constant 0 : index
    %c0_7 = arith.constant 0 : index
    %8 = vector.load %arg4[%c0_6, %c0_7] : memref<128x128xbf16, #tpu.memory_space<vmem>>, vector<128x128xbf16>
    %9 = arith.truncf %7 : vector<128x128xf32> to vector<128x128xbf16>
    %cst_8 = arith.constant dense<0.000000e+00> : vector<128x128xf32>
    %10 = tpu.matmul %8, %9, %cst_8 {dimension_numbers = #tpu.dot_dimension_numbers<[1], [0], [0], [1], [0, 0, 1, 1], [], []>} : vector<128x128xbf16>, vector<128x128xbf16>, vector<128x128xf32> -> vector<128x128xf32>
    %c0_9 = arith.constant 0 : index
    %c0_10 = arith.constant 0 : index
    %11 = vector.load %arg5[%c0_9, %c0_10] : memref<128x1xf32, #tpu.memory_space<vmem>>, vector<128x1xf32>
    %12 = vector.broadcast %11 : vector<128x1xf32> to vector<128x128xf32>
    %13 = arith.addf %10, %12 : vector<128x128xf32>
    %cst_11 = arith.constant 0.000000e+00 : f32
    %14 = vector.broadcast %cst_11 : f32 to vector<128x128xf32>
    %15 = arith.maximumf %13, %14 : vector<128x128xf32>
    %c0_12 = arith.constant 0 : index
    %c0_13 = arith.constant 0 : index
    %16 = vector.load %arg6[%c0_12, %c0_13] : memref<128x1xf32, #tpu.memory_space<vmem>>, vector<128x1xf32>
    %17 = vector.broadcast %16 : vector<128x1xf32> to vector<128x128xf32>
    %18 = arith.mulf %15, %17 : vector<128x128xf32>
    %cst_14 = arith.constant dense<0.000000e+00> : vector<128xf32>
    %19 = vector.multi_reduction <add>, %18, %cst_14 [0] : vector<128x128xf32> to vector<128xf32>
    %20 = vector.shape_cast %19 : vector<128xf32> to vector<1x128xf32>
    %c0_15 = arith.constant 0 : index
    %c0_16 = arith.constant 0 : index
    %21 = vector.load %arg7[%c0_15, %c0_16] : memref<1x1xf32, #tpu.memory_space<vmem>>, vector<1x1xf32>
    %22 = vector.broadcast %21 : vector<1x1xf32> to vector<1x128xf32>
    %23 = arith.addf %20, %22 : vector<1x128xf32>
    %c0_17 = arith.constant 0 : index
    %c0_18 = arith.constant 0 : index
    %24 = vector.load %arg8[%c0_17, %c0_18] : memref<1x128xf32, #tpu.memory_space<vmem>>, vector<1x128xf32>
    tpu.vector_store %arg8[%c0_17, %c0_18], %23 {strides = array<i32>} : memref<1x128xf32, #tpu.memory_space<vmem>>, vector<1x128xf32>,
    return
  }
  func.func @transform_0(%arg0: i32) -> (i32, i32) {
    %c0_i32 = arith.constant 0 : i32
    %c0_i32_0 = arith.constant 0 : i32
    return %c0_i32, %arg0 : i32, i32
  }
  func.func @transform_1(%arg0: i32) -> (i32, i32) {
    %c0_i32 = arith.constant 0 : i32
    %c0_i32_0 = arith.constant 0 : i32
    %c0_i32_1 = arith.constant 0 : i32
    return %c0_i32, %c0_i32_0 : i32, i32
  }
  func.func @transform_2(%arg0: i32) -> (i32, i32) {
    %c0_i32 = arith.constant 0 : i32
    %c0_i32_0 = arith.constant 0 : i32
    %c0_i32_1 = arith.constant 0 : i32
    return %c0_i32, %c0_i32_0 : i32, i32
  }
  func.func @transform_3(%arg0: i32) -> (i32, i32) {
    %c0_i32 = arith.constant 0 : i32
    %c0_i32_0 = arith.constant 0 : i32
    %c0_i32_1 = arith.constant 0 : i32
    return %c0_i32, %c0_i32_0 : i32, i32
  }
  func.func @transform_4(%arg0: i32) -> (i32, i32) {
    %c0_i32 = arith.constant 0 : i32
    %c0_i32_0 = arith.constant 0 : i32
    %c0_i32_1 = arith.constant 0 : i32
    return %c0_i32, %c0_i32_0 : i32, i32
  }
  func.func @transform_5(%arg0: i32) -> (i32, i32) {
    %c0_i32 = arith.constant 0 : i32
    %c0_i32_0 = arith.constant 0 : i32
    %c0_i32_1 = arith.constant 0 : i32
    return %c0_i32, %c0_i32_0 : i32, i32
  }
  func.func @transform_6(%arg0: i32) -> (i32, i32) {
    %c0_i32 = arith.constant 0 : i32
    %c0_i32_0 = arith.constant 0 : i32
    %c0_i32_1 = arith.constant 0 : i32
    return %c0_i32, %c0_i32_0 : i32, i32
  }
  func.func @transform_7(%arg0: i32) -> (i32, i32) {
    %c0_i32 = arith.constant 0 : i32
    %c0_i32_0 = arith.constant 0 : i32
    return %c0_i32, %arg0 : i32, i32
  }
}

</mosaic_0001>

<bundles_post_ra>
// kernel: critic_forward.1
= control target key start
LH: loop header
LB: loop body
LE: loop exit
PB: predicated region body
PF: predicated region fallthrough
CT: control target
= control target key end

     0   :  { %v893_v0 = vmov 0   ;;  %vm189_vm0 = vcmask 130048   ;;  %s1143_s2 = inlined_call_operand.vmem [shape: f32[128,1], index: 2, kind: input, shape index: {}]   ;;  %s1144_s0 = inlined_call_operand.vmem [shape: bf16[16,128], index: 0, kind: input, shape index: {}]   ;;  %s1145_s6 = inlined_call_operand.<no memory space> [shape: f32[1,1], index: 6, kind: input, shape index: {}]   ;;  %s1146_s1 = inlined_call_operand.vmem [shape: bf16[128,16], index: 1, kind: input, shape index: {}]   ;;  %s1147_s4 = inlined_call_operand.vmem [shape: f32[128,1], index: 4, kind: input, shape index: {}]   ;;  %s1148_s5 = inlined_call_operand.vmem [shape: f32[128,1], index: 5, kind: input, shape index: {}]   ;;  %s1149_s3 = inlined_call_operand.vmem [shape: bf16[128,128], index: 3, kind: input, shape index: {}]   ;;  %s1150_s7 = inlined_call_operand.vmem [shape: f32[1,128], index: 7, kind: output, shape index: {}]  }
   0x1   :  { %874 = vset.pattern.permute.xlu0 %v893_v0  ;;  %875 = vset.pattern.permute.xlu1 %v893_v0  ;;  %v47_v1 = vld [vmem:[%s1143_s2] sm:$0xff]  ;;  %v49_v2 = vld [vmem:[%s1143_s2 + $0x10] sm:$0xff]  ;;  %v12_v3 = vstv %s1145_s6  ;;  %v48_v5 = vld [vmem:[%s1143_s2 + $0x8] sm:$0xff] }
   0x2   :  { %65 = vperm.xlu0 %874, %v47_v1   ;;  %75 = vperm.xlu1 %875, %v49_v2   ;;  %v876_v4 = vld [vmem:[%s1144_s0] sm:$0xff]   ;;  %13 = vst [vmem:[#allocation2] sm:$0x1] %v12_v3  ;;  %v50_v6 = vld [vmem:[%s1143_s2 + $0x18] sm:$0xff]  ;;  %v878_v8 = vld [vmem:[%s1146_s1 + $0x8] sm:$0xff]  }
   0x3   :  { %807 = vmatprep.subr.bf16.mxu0 %v876_v4  ;;  %v877_v7 = vld [vmem:[%s1146_s1] sm:$0xff]   ;;  %v52_v10 = vld [vmem:[%s1143_s2 + $0x28] sm:$0xff]  ;;  %v879_v11 = vld [vmem:[%s1146_s1 + $0x10] sm:$0xff]  }
   0x4   :  { %808 = vmatpush3.bf16.msra.mxu0 %v876_v4  ;;  %v51_v9 = vld [vmem:[%s1143_s2 + $0x20] sm:$0xff]  ;;  %809 = vmatprep.mubr.msk.bf16.mxu0 %vm189_vm0, %v877_v7  ;;  %v53_v12 = vld [vmem:[%s1143_s2 + $0x30] sm:$0xff]  ;;  %v54_v13 = vld [vmem:[%s1143_s2 + $0x38] sm:$0xff] }
   0x5   :  { %v880_v14 = vld [vmem:[%s1146_s1 + $0x18] sm:$0xff]   ;;  %v881_v15 = vld [vmem:[%s1146_s1 + $0x20] sm:$0xff]   ;;  %v56_v17 = vld [vmem:[%s1143_s2 + $0x48] sm:$0xff] }
   0x6   :  { %70 = vperm.xlu0 %874, %v48_v5   ;;  %80 = vperm.xlu1 %875, %v50_v6   ;;  %v55_v16 = vld [vmem:[%s1143_s2 + $0x40] sm:$0xff]  ;;  %v57_v18 = vld [vmem:[%s1143_s2 + $0x50] sm:$0xff]  ;;  %v58_v19 = vld [vmem:[%s1143_s2 + $0x58] sm:$0xff] }
   0x7   :  { %810 = vmatmul.mubr.msk.bf16.vlgmr.msra.gmra.mrb[0].mxu0 %vm189_vm0, %v878_v8  ;;  %v882_v20 = vld [vmem:[%s1146_s1 + $0x28] sm:$0xff]   ;;  %v883_v21 = vld [vmem:[%s1146_s1 + $0x30] sm:$0xff]   ;;  %v59_v22 = vld [vmem:[%s1143_s2 + $0x60] sm:$0xff] }
   0x8   :  { %813 = vmatprep.mubr.msk.bf16.mxu0 %vm189_vm0, %v879_v11  ;;  %v60_v23 = vld [vmem:[%s1143_s2 + $0x68] sm:$0xff]  ;;  %v61_v24 = vld [vmem:[%s1143_s2 + $0x70] sm:$0xff]  ;;  %v62_v25 = vld [vmem:[%s1143_s2 + $0x78] sm:$0xff] }
   0x9   :  { %v884_v26 = vld [vmem:[%s1146_s1 + $0x38] sm:$0xff]   ;;  %v351_v27 = vld [vmem:[%s1147_s4] sm:$0xff]  ;;  %v352_v28 = vld [vmem:[%s1147_s4 + $0x8] sm:$0xff] }
   0xa   :  { %85 = vperm.xlu0 %874, %v51_v9   ;;  %90 = vperm.xlu1 %875, %v52_v10   ;;  %v353_v29 = vld [vmem:[%s1147_s4 + $0x10] sm:$0xff]  ;;  %v354_v30 = vld [vmem:[%s1147_s4 + $0x18] sm:$0xff]  ;;  %v355_v31 = vld [vmem:[%s1147_s4 + $0x20] sm:$0xff] }
   0xb   :  { %v356_v32 = vld [vmem:[%s1147_s4 + $0x28] sm:$0xff]  ;;  %v608_v33 = vld [vmem:[%s1148_s5] sm:$0xff]  ;;  %v610_v35 = vld [vmem:[%s1148_s5 + $0x10] sm:$0xff] }
   0xc   :  { %v609_v34 = vld [vmem:[%s1148_s5 + $0x8] sm:$0xff]  ;;  %v611_v36 = vld [vmem:[%s1148_s5 + $0x18] sm:$0xff]  ;;  %v357_v37 = vld [vmem:[%s1147_s4 + $0x30] sm:$0xff] }
   0xd   :  { %v612_v38 = vld [vmem:[%s1148_s5 + $0x20] sm:$0xff]  ;;  %v358_v39 = vld [vmem:[%s1147_s4 + $0x38] sm:$0xff]  ;;  %v613_v40 = vld [vmem:[%s1148_s5 + $0x28] sm:$0xff] }
   0xe   :  { %95 = vperm.xlu0 %874, %v53_v12   ;;  %100 = vperm.xlu1 %875, %v54_v13   ;;  %v359_v41 = vld [vmem:[%s1147_s4 + $0x40] sm:$0xff]  ;;  %v614_v42 = vld [vmem:[%s1148_s5 + $0x30] sm:$0xff]  ;;  %v360_v43 = vld [vmem:[%s1147_s4 + $0x48] sm:$0xff] }
   0xf   :  { %814 = vmatmul.mubr.msk.bf16.gmra.mrb[4].mxu0 %vm189_vm0, %v880_v14  ;;  %v615_v44 = vld [vmem:[%s1148_s5 + $0x38] sm:$0xff]  ;;  %v361_v45 = vld [vmem:[%s1147_s4 + $0x50] sm:$0xff]  ;;  %v616_v46 = vld [vmem:[%s1148_s5 + $0x40] sm:$0xff] }
  0x10   :  { %817 = vmatprep.mubr.msk.bf16.mxu0 %vm189_vm0, %v881_v15  ;;  %v362_v47 = vld [vmem:[%s1147_s4 + $0x58] sm:$0xff]  ;;  %v617_v48 = vld [vmem:[%s1148_s5 + $0x48] sm:$0xff]  ;;  %v363_v49 = vld [vmem:[%s1147_s4 + $0x60] sm:$0xff] }
  0x11   :  { %v618_v50 = vld [vmem:[%s1148_s5 + $0x50] sm:$0xff]  ;;  %v364_v51 = vld [vmem:[%s1147_s4 + $0x68] sm:$0xff]  ;;  %v619_v52 = vld [vmem:[%s1148_s5 + $0x58] sm:$0xff] }
  0x12   :  { %105 = vperm.xlu0 %874, %v55_v16   ;;  %110 = vperm.xlu1 %875, %v56_v17   ;;  %v365_v53 = vld [vmem:[%s1147_s4 + $0x70] sm:$0xff]  ;;  %v620_v54 = vld [vmem:[%s1148_s5 + $0x60] sm:$0xff]  ;;  %v366_v55 = vld [vmem:[%s1147_s4 + $0x78] sm:$0xff] }
  0x13   :  { %v621_v56 = vld [vmem:[%s1148_s5 + $0x68] sm:$0xff]  ;;  %v622_v57 = vld [vmem:[%s1148_s5 + $0x70] sm:$0xff]  ;;  %v623_v58 = vld [vmem:[%s1148_s5 + $0x78] sm:$0xff] }
  0x14   :  { %v741_v59 = vld [vmem:[#allocation2] sm:$0x1]  ;;  %v886_v61 = vld [vmem:[%s1149_s3 + $0x10] sm:$0xff]  }
  0x15   :  { %v885_v60 = vld [vmem:[%s1149_s3] sm:$0xff]   ;;  %845 = vmatprep.mubr.bf16.mxu1 %v886_v61 }
  0x16   :  { %115 = vperm.xlu0 %874, %v57_v18   ;;  %120 = vperm.xlu1 %875, %v58_v19  }
  0x17   :  { %818 = vmatmul.mubr.msk.bf16.gmra.mrb[8].mxu0 %vm189_vm0, %v882_v20 }
  0x18   :  { %821 = vmatprep.mubr.msk.bf16.mxu0 %vm189_vm0, %v883_v21 }
  0x1a   :  { %125 = vperm.xlu0 %874, %v59_v22   ;;  %130 = vperm.xlu1 %875, %v60_v23  }
  0x1e   :  { %135 = vperm.xlu0 %874, %v61_v24   ;;  %140 = vperm.xlu1 %875, %v62_v25  }
  0x1f   :  { %822 = vmatmul.mubr.msk.bf16.gmra.mrb[12].mxu0 %vm189_vm0, %v884_v26 }
  0x20   :  { %841 = vmatprep.mubr.bf16.mxu0 %v885_v60 }
  0x22   :  { %369 = vperm.xlu0 %874, %v351_v27   ;;  %374 = vperm.xlu1 %875, %v352_v28  }
  0x26   :  { %379 = vperm.xlu0 %874, %v353_v29   ;;  %384 = vperm.xlu1 %875, %v354_v30  }
  0x2a   :  { %389 = vperm.xlu0 %874, %v355_v31   ;;  %394 = vperm.xlu1 %875, %v356_v32  }
  0x2e   :  { %626 = vperm.xlu0 %874, %v608_v33   ;;  %631 = vperm.xlu1 %875, %v609_v34  }
  0x32   :  { %636 = vperm.xlu0 %874, %v610_v35   ;;  %641 = vperm.xlu1 %875, %v611_v36  }
  0x36   :  { %399 = vperm.xlu0 %874, %v357_v37   ;;  %646 = vperm.xlu1 %875, %v612_v38  }
  0x3a   :  { %404 = vperm.xlu0 %874, %v358_v39   ;;  %651 = vperm.xlu1 %875, %v613_v40  }
  0x3e   :  { %409 = vperm.xlu0 %874, %v359_v41   ;;  %656 = vperm.xlu1 %875, %v614_v42  }
  0x42   :  { %414 = vperm.xlu0 %874, %v360_v43   ;;  %661 = vperm.xlu1 %875, %v615_v44  }
  0x46   :  { %419 = vperm.xlu0 %874, %v361_v45   ;;  %666 = vperm.xlu1 %875, %v616_v46  }
  0x4a   :  { %424 = vperm.xlu0 %874, %v362_v47   ;;  %671 = vperm.xlu1 %875, %v617_v48  }
  0x4e   :  { %429 = vperm.xlu0 %874, %v363_v49   ;;  %676 = vperm.xlu1 %875, %v618_v50  }
  0x52   :  { %434 = vperm.xlu0 %874, %v364_v51   ;;  %681 = vperm.xlu1 %875, %v619_v52  }
  0x56   :  { %439 = vperm.xlu0 %874, %v365_v53   ;;  %686 = vperm.xlu1 %875, %v620_v54  }
  0x5a   :  { %444 = vperm.xlu0 %874, %v366_v55   ;;  %691 = vperm.xlu1 %875, %v621_v56  }
  0x5e   :  { %696 = vperm.xlu0 %874, %v622_v57   ;;  %701 = vperm.xlu1 %875, %v623_v58  }
  0x62   :  { %744 = vperm.xlu0 %874, %v741_v59  }
  0x81   :  { %v66_v62 = vpop.permute.xlu0 %65  ;;  %v76_v63 = vpop.permute.xlu1 %75 }
  0x85   :  { %v71_v0 = vpop.permute.xlu0 %70  ;;  %v81_v1 = vpop.permute.xlu1 %80 }
  0x89   :  { %v86_v2 = vpop.permute.xlu0 %85  ;;  %v91_v3 = vpop.permute.xlu1 %90 }
  0x8d   :  { %v96_v4 = vpop.permute.xlu0 %95  ;;  %v101_v8 = vpop.permute.xlu1 %100 }
  0x91   :  { %v106_v16 = vpop.permute.xlu0 %105  ;;  %v111_v20 = vpop.permute.xlu1 %110 }
  0x95   :  { %v116_v29 = vpop.permute.xlu0 %115  ;;  %v121_v33 = vpop.permute.xlu1 %120 }
  0x99   :  { %v126_v41 = vpop.permute.xlu0 %125  ;;  %v131_v46 = vpop.permute.xlu1 %130 }
  0x9d   :  { %v136_v53 = vpop.permute.xlu0 %135  ;;  %v141_v58 = vpop.permute.xlu1 %140 }
  0xda   :  { %v811_v5 = vpop.f32.mrb[0].mxu0 }
  0xdb   :  { %v257_v6 = vadd.f32 %v811_v5, %v76_v63  ;;  %v248_v7 = vpop.f32.mrb[1].mxu0 }
  0xdc   :  { %v249_v9 = vadd.f32 %v248_v7, %v66_v62  ;;  %v812_v10 = vpop.f32.mrb[2].mxu0  ;;  %v888_v7 = vld [vmem:[%s1149_s3 + $0x18] sm:$0xff]  }
  0xdd   :  { %v260_v11 = vadd.f32 %v812_v10, %v81_v1  ;;  %v251_v12 = vpop.f32.mrb[3].mxu0  ;;  %v313_v14 = vmax.f32 %v257_v6, 0.0  ;;  %v887_v6 = vld [vmem:[%s1149_s3 + $0x8] sm:$0xff]   ;;  %v891_v10 = vld [vmem:[%s1149_s3 + $0x30] sm:$0xff]  }
  0xde   :  { %v252_v13 = vadd.f32 %v251_v12, %v71_v0  ;;  %v311_v17 = vmax.f32 %v249_v9, 0.0  ;;  %v890_v9 = vld [vmem:[%s1149_s3 + $0x28] sm:$0xff]   ;;  %v370_v12 = vpop.permute.xlu0 %369 }
  0xdf   :  { %v314_v15 = vmax.f32 %v260_v11, 0.0  ;;  %v892_v11 = vld [vmem:[%s1149_s3 + $0x38] sm:$0xff]  }
  0xe0   :  { %v312_v18 = vmax.f32 %v252_v13, 0.0  ;;  %v375_v13 = vpop.permute.xlu1 %374 }
  0xe1   :  { %v344_v19 = vpack.c.bf16 %v314_v15, %v313_v14 }
  0xe2   :  { %v343_v21 = vpack.c.bf16 %v312_v18, %v311_v17  ;;  %v815_v22 = vpop.f32.mrb[4].mxu0  ;;  %v380_v14 = vpop.permute.xlu0 %379 }
  0xe3   :  { %v273_v23 = vadd.f32 %v815_v22, %v96_v4  ;;  %v264_v24 = vpop.f32.mrb[5].mxu0 }
  0xe4   :  { %v265_v25 = vadd.f32 %v264_v24, %v86_v2  ;;  %v816_v26 = vpop.f32.mrb[6].mxu0  ;;  %825 = vmatprep.subr.bf16.mxu0 %v343_v21  ;;  %857 = vmatprep.subr.bf16.mxu1 %v343_v21  ;;  %v385_v15 = vpop.permute.xlu1 %384 }
  0xe5   :  { %v276_v27 = vadd.f32 %v816_v26, %v101_v8  ;;  %v267_v28 = vpop.f32.mrb[7].mxu0  ;;  %826 = vmatpush3.bf16.msra.mxu0 %v343_v21  ;;  %865 = vmatpush3.bf16.msra.mxu1 %v343_v21  ;;  %v317_v31 = vmax.f32 %v273_v23, 0.0  ;;  %v889_v8 = vld [vmem:[%s1149_s3 + $0x20] sm:$0xff]  }
  0xe6   :  { %v268_v30 = vadd.f32 %v267_v28, %v91_v3  ;;  %827 = vmatprep.subr.bf16.mxu0 %v344_v19  ;;  %858 = vmatprep.subr.bf16.mxu1 %v344_v19  ;;  %v315_v34 = vmax.f32 %v265_v25, 0.0 }
  0xe7   :  { %v318_v32 = vmax.f32 %v276_v27, 0.0 }
  0xe8   :  { %v316_v35 = vmax.f32 %v268_v30, 0.0  ;;  %v395_v17 = vpop.permute.xlu1 %394 }
  0xe9   :  { %v346_v36 = vpack.c.bf16 %v318_v32, %v317_v31  ;;  %828 = vmatpush3.bf16.msra.mxu0 %v344_v19  ;;  %866 = vmatpush3.bf16.msra.mxu1 %v344_v19 }
  0xea   :  { %v345_v37 = vpack.c.bf16 %v316_v35, %v315_v34  ;;  %v819_v38 = vpop.f32.mrb[8].mxu0 }
  0xeb   :  { %v289_v39 = vadd.f32 %v819_v38, %v116_v29  ;;  %v280_v40 = vpop.f32.mrb[9].mxu0 }
  0xec   :  { %v281_v42 = vadd.f32 %v280_v40, %v106_v16  ;;  %v820_v43 = vpop.f32.mrb[10].mxu0  ;;  %829 = vmatprep.subr.bf16.mxu0 %v345_v37  ;;  %859 = vmatprep.subr.bf16.mxu1 %v345_v37  ;;  %v390_v16 = vpop.permute.xlu0 %389 }
  0xed   :  { %v292_v44 = vadd.f32 %v820_v43, %v121_v33  ;;  %v283_v45 = vpop.f32.mrb[11].mxu0  ;;  %830 = vmatpush3.bf16.msra.mxu0 %v345_v37  ;;  %867 = vmatpush3.bf16.msra.mxu1 %v345_v37  ;;  %v321_v48 = vmax.f32 %v289_v39, 0.0  ;;  %v632_v19 = vpop.permute.xlu1 %631 }
  0xee   :  { %v284_v47 = vadd.f32 %v283_v45, %v111_v20  ;;  %831 = vmatprep.subr.bf16.mxu0 %v346_v36  ;;  %860 = vmatprep.subr.bf16.mxu1 %v346_v36  ;;  %v319_v50 = vmax.f32 %v281_v42, 0.0 }
  0xef   :  { %v322_v49 = vmax.f32 %v292_v44, 0.0 }
  0xf0   :  { %v320_v51 = vmax.f32 %v284_v47, 0.0  ;;  %v627_v18 = vpop.permute.xlu0 %626 }
  0xf1   :  { %v348_v52 = vpack.c.bf16 %v322_v49, %v321_v48  ;;  %832 = vmatpush3.bf16.msra.mxu0 %v346_v36  ;;  %868 = vmatpush3.bf16.msra.mxu1 %v346_v36  ;;  %v642_v21 = vpop.permute.xlu1 %641 }
  0xf2   :  { %v347_v54 = vpack.c.bf16 %v320_v51, %v319_v50  ;;  %v823_v55 = vpop.f32.mrb[12].mxu0 }
  0xf3   :  { %v305_v56 = vadd.f32 %v823_v55, %v136_v53  ;;  %v296_v57 = vpop.f32.mrb[13].mxu0 }
  0xf4   :  { %v297_v59 = vadd.f32 %v296_v57, %v126_v41  ;;  %v824_v60 = vpop.f32.mrb[14].mxu0  ;;  %833 = vmatprep.subr.bf16.mxu0 %v347_v54  ;;  %861 = vmatprep.subr.bf16.mxu1 %v347_v54  ;;  %v637_v20 = vpop.permute.xlu0 %636 }
  0xf5   :  { %v308_v61 = vadd.f32 %v824_v60, %v141_v58  ;;  %v299_v62 = vpop.f32.mrb[15].mxu0  ;;  %834 = vmatpush3.bf16.msra.mxu0 %v347_v54  ;;  %869 = vmatpush3.bf16.msra.mxu1 %v347_v54  ;;  %v325_v0 = vmax.f32 %v305_v56, 0.0  ;;  %v647_v23 = vpop.permute.xlu1 %646 }
  0xf6   :  { %v300_v63 = vadd.f32 %v299_v62, %v131_v46  ;;  %835 = vmatprep.subr.bf16.mxu0 %v348_v52  ;;  %862 = vmatprep.subr.bf16.mxu1 %v348_v52  ;;  %v323_v2 = vmax.f32 %v297_v59, 0.0 }
  0xf7   :  { %v326_v1 = vmax.f32 %v308_v61, 0.0 }
  0xf8   :  { %v324_v3 = vmax.f32 %v300_v63, 0.0  ;;  %v400_v22 = vpop.permute.xlu0 %399 }
  0xf9   :  { %v350_v4 = vpack.c.bf16 %v326_v1, %v325_v0  ;;  %836 = vmatpush3.bf16.msra.mxu0 %v348_v52  ;;  %870 = vmatpush3.bf16.msra.mxu1 %v348_v52  ;;  %v652_v25 = vpop.permute.xlu1 %651 }
  0xfa   :  { %v349_v5 = vpack.c.bf16 %v324_v3, %v323_v2 }
  0xfc   :  { %837 = vmatprep.subr.bf16.mxu0 %v349_v5  ;;  %863 = vmatprep.subr.bf16.mxu1 %v349_v5  ;;  %v405_v24 = vpop.permute.xlu0 %404 }
  0xfd   :  { %838 = vmatpush3.bf16.msra.mxu0 %v349_v5  ;;  %871 = vmatpush3.bf16.msra.mxu1 %v349_v5  ;;  %v657_v27 = vpop.permute.xlu1 %656 }
  0xfe   :  { %839 = vmatprep.subr.bf16.mxu0 %v350_v4  ;;  %864 = vmatprep.subr.bf16.mxu1 %v350_v4 }
 0x100   :  { %v410_v26 = vpop.permute.xlu0 %409 }
 0x101   :  { %840 = vmatpush3.bf16.msra.mxu0 %v350_v4  ;;  %872 = vmatpush3.bf16.msra.mxu1 %v350_v4  ;;  %v662_v29 = vpop.permute.xlu1 %661 }
 0x104   :  { %842 = vmatmul.mubr.bf16.vlgmr.msra.gmra.mrb[16].mxu0 %v887_v6  ;;  %846 = vmatmul.mubr.bf16.vlgmr.msra.gmra.mrb[0].mxu1 %v888_v7  ;;  %v415_v28 = vpop.permute.xlu0 %414 }
 0x105   :  { %849 = vmatprep.mubr.bf16.mxu1 %v889_v8  ;;  %v667_v31 = vpop.permute.xlu1 %666 }
 0x108   :  { %v420_v30 = vpop.permute.xlu0 %419 }
 0x109   :  { %v672_v46 = vpop.permute.xlu1 %671 }
 0x10c   :  { %850 = vmatmul.mubr.bf16.gmra.mrb[4].mxu1 %v890_v9  ;;  %v425_v32 = vpop.permute.xlu0 %424 }
 0x10d   :  { %853 = vmatprep.mubr.bf16.mxu1 %v891_v10  ;;  %v677_v62 = vpop.permute.xlu1 %676 }
 0x110   :  { %v430_v55 = vpop.permute.xlu0 %429 }
 0x114   :  { %854 = vmatmul.mubr.bf16.gmra.mrb[8].mxu1 %v892_v11  ;;  %v435_v8 = vpop.permute.xlu0 %434 }
 0x1d7   :  { %v843_v33 = vpop.f32.mrb[16].mxu0  ;;  %v847_v34 = vpop.f32.mrb[0].mxu1 }
 0x1d8   :  { %v529_v35 = vpop.f32.mrb[17].mxu0  ;;  %v545_v36 = vpop.f32.mrb[1].mxu1  ;;  %v538_v37 = vadd.f32 %v843_v33, %v380_v14  ;;  %v554_v58 = vadd.f32 %v847_v34, %v400_v22 }
 0x1d9   :  { %v530_v38 = vadd.f32 %v529_v35, %v370_v12  ;;  %v844_v39 = vpop.f32.mrb[18].mxu0  ;;  %v848_v40 = vpop.f32.mrb[2].mxu1  ;;  %v546_v48 = vadd.f32 %v545_v36, %v390_v16 }
 0x1da   :  { %v532_v41 = vpop.f32.mrb[19].mxu0  ;;  %v548_v42 = vpop.f32.mrb[3].mxu1  ;;  %v541_v44 = vadd.f32 %v844_v39, %v385_v15  ;;  %v594_v47 = vmax.f32 %v538_v37, 0.0  ;;  %v557_v1 = vadd.f32 %v848_v40, %v405_v24  ;;  %v598_v4 = vmax.f32 %v554_v58, 0.0 }
 0x1db   :  { %v592_v43 = vmax.f32 %v530_v38, 0.0  ;;  %v533_v45 = vadd.f32 %v532_v41, %v375_v13  ;;  %v549_v53 = vadd.f32 %v548_v42, %v395_v17  ;;  %v596_v59 = vmax.f32 %v546_v48, 0.0  ;;  %v682_v14 = vpop.permute.xlu1 %681  ;;  %v440_v34 = vpop.permute.xlu0 %439 }
 0x1dc   :  { %v595_v51 = vmax.f32 %v541_v44, 0.0  ;;  %v706_v57 = vmul.f32 %v637_v20, %v594_v47  ;;  %v599_v9 = vmax.f32 %v557_v1, 0.0  ;;  %v710_v16 = vmul.f32 %v657_v27, %v598_v4 }
 0x1dd   :  { %v593_v49 = vmax.f32 %v533_v45, 0.0  ;;  %v704_v50 = vmul.f32 %v627_v18, %v592_v43  ;;  %v597_v3 = vmax.f32 %v549_v53, 0.0  ;;  %v708_v5 = vmul.f32 %v647_v23, %v596_v59 }
 0x1de   :  { %v707_v0 = vmul.f32 %v642_v21, %v595_v51  ;;  %v711_v22 = vmul.f32 %v662_v29, %v599_v9  ;;  %v747_v58 = vlaneseq }
 0x1df   :  { %v705_v52 = vmul.f32 %v632_v19, %v593_v49  ;;  %v851_v54 = vpop.f32.mrb[4].mxu1  ;;  %v709_v10 = vmul.f32 %v652_v25, %v597_v3  ;;  %v687_v37 = vpop.permute.xlu1 %686 }
 0x1e0   :  { %v561_v56 = vpop.f32.mrb[5].mxu1  ;;  %v570_v18 = vadd.f32 %v851_v54, %v420_v30  ;;  %v445_v43 = vpop.permute.xlu0 %444 }
 0x1e1   :  { %v720_v60 = vadd.f32 %v705_v52, %v704_v50  ;;  %v852_v61 = vpop.f32.mrb[6].mxu1  ;;  %v562_v7 = vadd.f32 %v561_v56, %v410_v26 }
 0x1e2   :  { %v564_v63 = vpop.f32.mrb[7].mxu1  ;;  %v573_v33 = vadd.f32 %v852_v61, %v425_v32  ;;  %v602_v26 = vmax.f32 %v570_v18, 0.0  ;;  %v748_v61 = vshrl.u32 %v747_v58, 7 }
 0x1e3   :  { %v721_v2 = vadd.f32 %v720_v60, %v706_v57  ;;  %v565_v12 = vadd.f32 %v564_v63, %v415_v28  ;;  %v600_v19 = vmax.f32 %v562_v7, 0.0  ;;  %v692_v47 = vpop.permute.xlu1 %691 }
 0x1e4   :  { %v603_v38 = vmax.f32 %v573_v33, 0.0  ;;  %v714_v27 = vmul.f32 %v677_v62, %v602_v26  ;;  %v697_v53 = vpop.permute.xlu0 %696 }
 0x1e5   :  { %v722_v6 = vadd.f32 %v721_v2, %v707_v0  ;;  %v601_v23 = vmax.f32 %v565_v12, 0.0  ;;  %v712_v35 = vmul.f32 %v667_v31, %v600_v19  ;;  %v749_v0 = vsub.s32 0, %v748_v61 }
 0x1e6   :  { %v715_v44 = vmul.f32 %v682_v14, %v603_v38 }
 0x1e7   :  { %v723_v11 = vadd.f32 %v722_v6, %v708_v5  ;;  %v855_v13 = vpop.f32.mrb[8].mxu1  ;;  %v713_v39 = vmul.f32 %v672_v46, %v601_v23 }
 0x1e8   :  { %v577_v15 = vpop.f32.mrb[9].mxu1  ;;  %v586_v30 = vadd.f32 %v855_v13, %v440_v34  ;;  %v745_v2 = vpop.permute.xlu0 %744 }
 0x1e9   :  { %v724_v17 = vadd.f32 %v723_v11, %v709_v10  ;;  %v856_v20 = vpop.f32.mrb[10].mxu1  ;;  %v578_v25 = vadd.f32 %v577_v15, %v430_v55  ;;  %v702_v55 = vpop.permute.xlu1 %701  ;;  %v750_v4 = vrot.slane %v745_v2, %v749_v0 }
 0x1ea   :  { %v580_v21 = vpop.f32.mrb[11].mxu1  ;;  %v589_v45 = vadd.f32 %v856_v20, %v445_v43  ;;  %v606_v48 = vmax.f32 %v586_v30, 0.0 }
 0x1eb   :  { %v725_v24 = vadd.f32 %v724_v17, %v710_v16  ;;  %v581_v40 = vadd.f32 %v580_v21, %v435_v8  ;;  %v604_v42 = vmax.f32 %v578_v25, 0.0 }
 0x1ec   :  { %v607_v51 = vmax.f32 %v589_v45, 0.0  ;;  %v718_v54 = vmul.f32 %v697_v53, %v606_v48 }
 0x1ed   :  { %v726_v36 = vadd.f32 %v725_v24, %v711_v22  ;;  %v605_v32 = vmax.f32 %v581_v40, 0.0  ;;  %v716_v49 = vmul.f32 %v687_v37, %v604_v42 }
 0x1ee   :  { %v719_v56 = vmul.f32 %v702_v55, %v607_v51 }
 0x1ef   :  { %v727_v28 = vadd.f32 %v726_v36, %v712_v35  ;;  %v717_v52 = vmul.f32 %v692_v47, %v605_v32 }
 0x1f1   :  { %v728_v41 = vadd.f32 %v727_v28, %v713_v39 }
 0x1f3   :  { %v729_v29 = vadd.f32 %v728_v41, %v714_v27 }
 0x1f5   :  { %v730_v31 = vadd.f32 %v729_v29, %v715_v44 }
 0x1f7   :  { %v731_v50 = vadd.f32 %v730_v31, %v716_v49 }
 0x1f9   :  { %v732_v46 = vadd.f32 %v731_v50, %v717_v52 }
 0x1fb   :  { %v733_v57 = vadd.f32 %v732_v46, %v718_v54 }
 0x1fd   :  { %v734_v59 = vadd.f32 %v733_v57, %v719_v56 }
 0x1ff   :  { %v735_v60 = vrot.slane %v734_v59, 4 }
 0x201   :  { %v736_v62 = vadd.f32 %v735_v60, %v734_v59 }
 0x203   :  { %v737_v63 = vrot.slane %v736_v62, 2 }
 0x205   :  { %v738_v1 = vadd.f32 %v737_v63, %v736_v62 }
 0x207   :  { %v739_v3 = vrot.slane %v738_v1, 1 }
 0x209   :  { %v740_v5 = vadd.f32 %v739_v3, %v738_v1 }
 0x20b   :  { %v751_v6 = vadd.f32 %v750_v4, %v740_v5 }
 0x20d   :  { %752 = vst [vmem:[%s1150_s7] sm:$0x1] %v751_v6 }

</bundles_post_ra>
